<compile_context>
chip_gen: v6e
topology: v6e:2x2x1
jax: 0.10.0
libtpu: 0.0.40
codegen_flags: <defaults>
</compile_context>

<pallas_src>
import functools

import jax
import jax.numpy as jnp
from jax.experimental import pallas as pl
from jax.experimental.pallas import tpu as pltpu


def _round_up(x, m):
    return (x + m - 1) // m * m


def _outconv_kernel(x_ref, w1_ref, b1_ref, w2_ref, b2_ref, o_ref):
    # x_ref:  (1, C_in, T)    f32 activation tile (spatial on lanes)
    # w1_ref: (C_mid, C_in)   bf16, BN scale folded into rows
    # b1_ref: (C_mid, 1)      f32, conv1 bias + BN shift folded
    # w2_ref: (C_out, C_mid)  bf16
    # b2_ref: (C_out, 1)      f32
    # o_ref:  (1, C_out, T)   lane-dense output tile
    x = x_ref[0].astype(jnp.bfloat16)                          # cast in-kernel
    h = jnp.dot(w1_ref[...], x, preferred_element_type=jnp.float32)
    h = jnp.maximum(h + b1_ref[...], 0.0)                      # (C_mid, T) f32
    y = jnp.dot(w2_ref[...], h.astype(w2_ref.dtype),
                preferred_element_type=jnp.float32) + b2_ref[...]
    o_ref[0] = y.astype(o_ref.dtype)


@functools.partial(jax.jit, static_argnames=("tile_hw", "out_dtype"))
def outconv_forward(x_nchw, params, tile_hw=8192, out_dtype=jnp.float32):
    """x_nchw: (N, C_in, H, W) float32.  Returns (N, C_out, H, W) out_dtype.

    out_dtype=jnp.bfloat16 halves output HBM traffic if the caller can accept
    a bf16 result; default f32 matches the PyTorch module.
    """
    w1, b1, gamma, beta, running_mean, running_var, w2, b2 = (
        params["w1"], params["b1"], params["gamma"], params["beta"],
        params["running_mean"], params["running_var"], params["w2"], params["b2"],
    )
    eps = 1e-5
    N, C_in, H, W = x_nchw.shape
    C_mid = w1.shape[0]
    C_out = w2.shape[0]
    hw = H * W
    out_bytes = jnp.dtype(out_dtype).itemsize

    # ---- spatial tile selection (all static Python ints) -------------------
    lane = 128
    tile = _round_up(min(tile_hw, _round_up(hw, lane)), lane)

    # Per-step VMEM: double-buffered input/output blocks + in-kernel temps.
    # Keep under a cap that fits every generation's default scoped VMEM.
    def _step_bytes(t):
        return t * (2 * C_in * 4            # input block (f32), double-buffered
                    + 2 * C_out * out_bytes  # output block, double-buffered
                    + C_in * 2               # in-kernel bf16 copy of x
                    + C_mid * 4 + C_mid * 2  # h (f32) + bf16 copy for 2nd dot
                    + C_out * 4)             # y before store
    vmem_budget = 12 << 20                   # safe on v5e's 16 MiB default
    while tile > lane and _step_bytes(tile) > vmem_budget:
        tile = _round_up(tile // 2, lane)

    # Keep >= ~8 grid steps (v7x megacore + pipelining) as long as each input
    # block stays >= ~1 MiB; never worth it for tiny problems.
    while (N * pl.cdiv(hw, tile) < 8 and tile > lane
           and (tile // 2) * C_in * 4 >= (1 << 20)):
        tile = _round_up(tile // 2, lane)

    # If a single block covers the whole row, use the exact row length
    # (full-dim blocks are always legal; avoids a padded boundary block).
    if tile >= hw:
        tile = hw
    n_tiles = pl.cdiv(hw, tile)

    # ---- fold conv1 bias + BatchNorm (inference) into W1 / b1 --------------
    inv_std = 1.0 / jnp.sqrt(running_var + eps)
    scale = gamma * inv_std                                    # (C_mid,)
    w1_2d = (w1.reshape(C_mid, C_in) * scale[:, None]).astype(jnp.bfloat16)
    b1_f = ((b1 - running_mean) * scale + beta).reshape(C_mid, 1)
    w2_2d = w2.reshape(C_out, C_mid).astype(jnp.bfloat16)
    b2_f = b2.reshape(C_out, 1)

    # NCHW -> (N, C_in, H*W): pure reshape, no copy, no dtype cast.
    x3 = x_nchw.reshape(N, C_in, hw)

    flops = 2 * N * hw * (C_in * C_mid + C_mid * C_out)
    bytes_accessed = (N * C_in * hw * 4                 # f32 activations in
                      + N * C_out * hw * out_bytes      # activations out
                      + (C_mid * C_in + C_out * C_mid) * 2
                      + (C_mid + C_out) * 4)

    out = pl.pallas_call(
        _outconv_kernel,
        out_shape=jax.ShapeDtypeStruct((N, C_out, hw), out_dtype),
        grid_spec=pltpu.PrefetchScalarGridSpec(
            num_scalar_prefetch=0,
            grid=(N, n_tiles),
            in_specs=[
                pl.BlockSpec((1, C_in, tile), lambda n, t: (n, 0, t)),
                pl.BlockSpec((C_mid, C_in), lambda n, t: (0, 0)),
                pl.BlockSpec((C_mid, 1), lambda n, t: (0, 0)),
                pl.BlockSpec((C_out, C_mid), lambda n, t: (0, 0)),
                pl.BlockSpec((C_out, 1), lambda n, t: (0, 0)),
            ],
            out_specs=pl.BlockSpec((1, C_out, tile), lambda n, t: (n, 0, t)),
        ),
        compiler_params=pltpu.CompilerParams(
            dimension_semantics=("parallel", "parallel")),
        cost_estimate=pl.CostEstimate(
            flops=flops, transcendentals=0, bytes_accessed=bytes_accessed),
    )(x3, w1_2d, b1_f, w2_2d, b2_f)

    # (N, C_out, H*W) -> NCHW is a pure reshape (no copy, no slice).
    return out.reshape(N, C_out, H, W)


def init_params(key, in_ch, out_ch):
    c_mid = in_ch // 2
    k1, k2, k3, k4 = jax.random.split(key, 4)
    # Conv2d(in_ch, in_ch//2, 1): weight (c_mid, in_ch, 1, 1), bias (c_mid,)
    w1 = jax.random.normal(k1, (c_mid, in_ch, 1, 1), jnp.float32) * 0.1
    b1 = jax.random.normal(k2, (c_mid,), jnp.float32) * 0.1
    # BatchNorm2d(c_mid) defaults
    gamma = jnp.ones((c_mid,), jnp.float32)
    beta = jnp.zeros((c_mid,), jnp.float32)
    running_mean = jnp.zeros((c_mid,), jnp.float32)
    running_var = jnp.ones((c_mid,), jnp.float32)
    # Conv2d(c_mid, out_ch, 1): weight (out_ch, c_mid, 1, 1), bias (out_ch,)
    w2 = jax.random.normal(k3, (out_ch, c_mid, 1, 1), jnp.float32) * 0.1
    b2 = jax.random.normal(k4, (out_ch,), jnp.float32) * 0.1
    return dict(w1=w1, b1=b1, gamma=gamma, beta=beta,
                running_mean=running_mean, running_var=running_var,
                w2=w2, b2=b2)


def _reference(x_nchw, params):
    """Pure-JAX f32 reference (eval-mode BN), for sanity checking."""
    eps = 1e-5
    w1 = params["w1"][:, :, 0, 0]
    w2 = params["w2"][:, :, 0, 0]
    h = jnp.einsum("nchw,oc->nohw", x_nchw, w1) + params["b1"][None, :, None, None]
    h = (h - params["running_mean"][None, :, None, None]) / jnp.sqrt(
        params["running_var"][None, :, None, None] + eps)
    h = h * params["gamma"][None, :, None, None] + params["beta"][None, :, None, None]
    h = jnp.maximum(h, 0.0)
    y = jnp.einsum("nchw,oc->nohw", h, w2) + params["b2"][None, :, None, None]
    return y


if __name__ == "__main__":
    key = jax.random.PRNGKey(0)
    kx, kp = jax.random.split(key)

    N, C_in, H, W = 2, 4, 16, 16
    C_out = 3

    x = jax.random.normal(kx, (N, C_in, H, W), jnp.float32)
    params = init_params(kp, C_in, C_out)

    y = outconv_forward(x, params)
    y = jax.block_until_ready(y)

    y_ref = _reference(x, params)
    assert y.shape == (N, C_out, H, W), y.shape
    # bf16 MXU inputs inside the kernel, f32 reference -> relaxed tolerance.
    assert jnp.allclose(y, y_ref, atol=2e-2, rtol=2e-2), "mismatch vs reference"

    print("KERNEL_OK")
</pallas_src>

<mosaic_0001>
module attributes {stable_mosaic.version = 11 : i64} {
  func.func @_outconv_kernel(%arg0: i32, %arg1: i32, %arg2: memref<1x4x256xf32, #tpu.memory_space<vmem>>, %arg3: memref<2x4xbf16, #tpu.memory_space<vmem>>, %arg4: memref<2x1xf32, #tpu.memory_space<vmem>>, %arg5: memref<3x2xbf16, #tpu.memory_space<vmem>>, %arg6: memref<3x1xf32, #tpu.memory_space<vmem>>, %arg7: memref<1x3x256xf32, #tpu.memory_space<vmem>>) attributes {dimension_semantics = [#tpu.dimension_semantics<parallel>, #tpu.dimension_semantics<parallel>], iteration_bounds = array<i64: 2, 1>, scalar_prefetch = 0 : i64, scratch_operands = 0 : i64, tpu.core_type = #tpu.core_type<tc>, window_params = [{transform_indices = @transform_0, window_bounds = array<i64: 1, 4, 256>}, {pipeline_mode = #tpu.pipeline_mode<synchronous>, transform_indices = @transform_1, window_bounds = array<i64: 2, 4>}, {pipeline_mode = #tpu.pipeline_mode<synchronous>, transform_indices = @transform_2, window_bounds = array<i64: 2, 1>}, {pipeline_mode = #tpu.pipeline_mode<synchronous>, transform_indices = @transform_3, window_bounds = array<i64: 3, 2>}, {pipeline_mode = #tpu.pipeline_mode<synchronous>, transform_indices = @transform_4, window_bounds = array<i64: 3, 1>}, {transform_indices = @transform_5, window_bounds = array<i64: 1, 3, 256>}]} {
    %c0 = arith.constant 0 : index
    %c0_0 = arith.constant 0 : index
    %c0_1 = arith.constant 0 : index
    %0 = vector.load %arg2[%c0, %c0_0, %c0_1] : memref<1x4x256xf32, #tpu.memory_space<vmem>>, vector<1x4x256xf32>
    %1 = vector.shape_cast %0 : vector<1x4x256xf32> to vector<4x256xf32>
    %2 = arith.truncf %1 : vector<4x256xf32> to vector<4x256xbf16>
    %c0_2 = arith.constant 0 : index
    %c0_3 = arith.constant 0 : index
    %3 = vector.load %arg3[%c0_2, %c0_3] : memref<2x4xbf16, #tpu.memory_space<vmem>>, vector<2x4xbf16>
    %cst = arith.constant dense<0.000000e+00> : vector<2x256xf32>
    %4 = tpu.matmul %3, %2, %cst {dimension_numbers = #tpu.dot_dimension_numbers<[1], [0], [0], [1], [0, 0, 1, 1], [], []>} : vector<2x4xbf16>, vector<4x256xbf16>, vector<2x256xf32> -> vector<2x256xf32>
    %c0_4 = arith.constant 0 : index
    %c0_5 = arith.constant 0 : index
    %5 = vector.load %arg4[%c0_4, %c0_5] : memref<2x1xf32, #tpu.memory_space<vmem>>, vector<2x1xf32>
    %6 = vector.broadcast %5 : vector<2x1xf32> to vector<2x256xf32>
    %7 = arith.addf %4, %6 : vector<2x256xf32>
    %cst_6 = arith.constant 0.000000e+00 : f32
    %8 = vector.broadcast %cst_6 : f32 to vector<2x256xf32>
    %9 = arith.maximumf %7, %8 : vector<2x256xf32>
    %c0_7 = arith.constant 0 : index
    %c0_8 = arith.constant 0 : index
    %10 = vector.load %arg5[%c0_7, %c0_8] : memref<3x2xbf16, #tpu.memory_space<vmem>>, vector<3x2xbf16>
    %11 = arith.truncf %9 : vector<2x256xf32> to vector<2x256xbf16>
    %cst_9 = arith.constant dense<0.000000e+00> : vector<3x256xf32>
    %12 = tpu.matmul %10, %11, %cst_9 {dimension_numbers = #tpu.dot_dimension_numbers<[1], [0], [0], [1], [0, 0, 1, 1], [], []>} : vector<3x2xbf16>, vector<2x256xbf16>, vector<3x256xf32> -> vector<3x256xf32>
    %c0_10 = arith.constant 0 : index
    %c0_11 = arith.constant 0 : index
    %13 = vector.load %arg6[%c0_10, %c0_11] : memref<3x1xf32, #tpu.memory_space<vmem>>, vector<3x1xf32>
    %14 = vector.broadcast %13 : vector<3x1xf32> to vector<3x256xf32>
    %15 = arith.addf %12, %14 : vector<3x256xf32>
    %c0_12 = arith.constant 0 : index
    %c0_13 = arith.constant 0 : index
    %c0_14 = arith.constant 0 : index
    %16 = vector.load %arg7[%c0_12, %c0_13, %c0_14] : memref<1x3x256xf32, #tpu.memory_space<vmem>>, vector<1x3x256xf32>
    %17 = vector.shape_cast %16 : vector<1x3x256xf32> to vector<3x256xf32>
    %18 = vector.shape_cast %15 : vector<3x256xf32> to vector<1x3x256xf32>
    tpu.vector_store %arg7[%c0_12, %c0_13, %c0_14], %18 {strides = array<i32>} : memref<1x3x256xf32, #tpu.memory_space<vmem>>, vector<1x3x256xf32>,
    return
  }
  func.func @transform_0(%arg0: i32, %arg1: i32) -> (i32, i32, i32) {
    %c0_i32 = arith.constant 0 : i32
    %c0_i32_0 = arith.constant 0 : i32
    return %arg0, %c0_i32, %arg1 : i32, i32, i32
  }
  func.func @transform_1(%arg0: i32, %arg1: i32) -> (i32, i32) {
    %c0_i32 = arith.constant 0 : i32
    %c0_i32_0 = arith.constant 0 : i32
    %c0_i32_1 = arith.constant 0 : i32
    return %c0_i32, %c0_i32_0 : i32, i32
  }
  func.func @transform_2(%arg0: i32, %arg1: i32) -> (i32, i32) {
    %c0_i32 = arith.constant 0 : i32
    %c0_i32_0 = arith.constant 0 : i32
    %c0_i32_1 = arith.constant 0 : i32
    return %c0_i32, %c0_i32_0 : i32, i32
  }
  func.func @transform_3(%arg0: i32, %arg1: i32) -> (i32, i32) {
    %c0_i32 = arith.constant 0 : i32
    %c0_i32_0 = arith.constant 0 : i32
    %c0_i32_1 = arith.constant 0 : i32
    return %c0_i32, %c0_i32_0 : i32, i32
  }
  func.func @transform_4(%arg0: i32, %arg1: i32) -> (i32, i32) {
    %c0_i32 = arith.constant 0 : i32
    %c0_i32_0 = arith.constant 0 : i32
    %c0_i32_1 = arith.constant 0 : i32
    return %c0_i32, %c0_i32_0 : i32, i32
  }
  func.func @transform_5(%arg0: i32, %arg1: i32) -> (i32, i32, i32) {
    %c0_i32 = arith.constant 0 : i32
    %c0_i32_0 = arith.constant 0 : i32
    return %arg0, %c0_i32, %arg1 : i32, i32, i32
  }
}

</mosaic_0001>

<bundles_post_ra>
// kernel: outconv_forward.1
= control target key start
LH: loop header
LB: loop body
LE: loop exit
PB: predicated region body
PF: predicated region fallthrough
CT: control target
= control target key end

     0   :  { %s584_s18 = smov 0   ;;  %s586_s19 = smov 0   ;;  %s636_s0 = inlined_call_operand.vmem [shape: f32[2,4,256], index: 0, kind: input, shape index: {}]   ;;  %s637_s1 = inlined_call_operand.vmem [shape: bf16[2,4], index: 1, kind: input, shape index: {}]   ;;  %s638_s2 = inlined_call_operand.vmem [shape: f32[2,1], index: 2, kind: input, shape index: {}]   ;;  %s639_s3 = inlined_call_operand.vmem [shape: bf16[3,2], index: 3, kind: input, shape index: {}]   ;;  %s640_s4 = inlined_call_operand.vmem [shape: f32[3,1], index: 4, kind: input, shape index: {}]   ;;  %s641_s5 = inlined_call_operand.vmem [shape: f32[2,3,256], index: 5, kind: output, shape index: {}]  }
   0x1   :  { %s588_s20 = smov 0  }
   0x2 LB: > { %s27_s21 = sadd.s32 1, %s547_s19  ;;  %p489_p0 = scmp.ge.s32.totalorder %s551_s20, 1  ;;  %s551_s20 = sphi %s588_s20, %s15_s20   ;;  %s547_s19 = sphi %s586_s19, %s643_s19   ;;  %s543_s18 = sphi %s584_s18, %s642_s18  }
   0x3   : > { %p29_p1 = scmp.ge.s32.totalorder %s27_s21, 2  ;;  %p208_p2 = scmp.lt.s32.totalorder %s551_s20, 3 }
   0x5   : > { %s645_s21 = smov (%p29_p1, %s27_s21), 0  ;;  %p209_p3 = pnand %p489_p0, %p208_p2 }
   0x6   : > { %p245_p4 = scmp.lt.s32.totalorder (!%p209_p3), %s543_s18, 1 }
   0x7   : > { %212 = sbr.rel (%p209_p3) target bundleno = 429 (0x1ad), region = 40 }
   0xc   : > { %v553_v0 = vmov 0   ;;  %v272_v1 = vld [vmem:[%s638_s2] sm:$0x3]  ;;  %s647_s18 = smov (!%p245_p4, %s543_s18), 1  ;;  %vm282_vm0 = vcmask 1041408   ;;  %vm278_vm1 = vcmask 31744  }
   0xd   : > { %321 = vmatprep.mubr.bf16.mxu0 %v553_v0  ;;  %527 = vset.pattern.permute.xlu0 %v553_v0  ;;  %v335_v2 = vld [vmem:[%s640_s4] sm:$0x7]  ;;  %s500_s26 = sshll.u32 %s647_s18, 3  ;;  %vm345_vm2 = vcmask 1040384   ;;  %vm341_vm3 = vcmask 15360  }
   0xe   : > { %275 = vperm.xlu0 %527, %v272_v1   ;;  %384 = vmatprep.mubr.bf16.mxu1 %v553_v0  ;;  %s252_s29 = scalar_lea.vmem %s636_s0, %s500_s26  ;;  %v271_v8 = vld [vmem:[%s637_s1] sm:$0x1]  ;;  %s262_s11 = scalar_lea.vmem %s641_s5, %s500_s26 }
   0xf   : > { %v265_v3 = vld [vmem:[%s252_s29] sm:$0xff] }
  0x10   : > { %v267_v4 = vcombine.high %v265_v3, %v265_v3  ;;  %v269_v5 = vpack.c.bf16 %v265_v3, %v265_v3  ;;  %v332_v21 = vld [vmem:[%s639_s3] sm:$0x3] }
  0x12   : > { %338 = vperm.xlu0 %527, %v335_v2   ;;  %v270_v6 = vpack.c.bf16 %v267_v4, %v267_v4  ;;  %v284_v7 = vsel %vm282_vm0, %v269_v5, 0 }
  0x14   : > { %494 = vmatprep.subr.msk.bf16.mxu0 %vm282_vm0, %v270_v6 }
  0x15   : > { %304 = vmatpush1.bf16.msra.mxu0 %v284_v7 }
  0x18   : > { %495 = vmatmul.mubr.msk.bf16.vlgmr.msra.gmra.mxu0 %vm278_vm1, %v271_v8 }
  0x89   : > { %v276_v9 = vpop.permute.xlu0 %275 }
  0x8d   : > { %v339_v23 = vpop.permute.xlu0 %338 }
  0xd8   : > { %v323_v10 = vpop.f32.mrf.mxu0 }
  0xd9   : > { %v324_v11 = vadd.f32 %v323_v10, %v276_v9 }
  0xda   : > { %v325_v12 = vpop.f32.mrf.mxu0 }
  0xdb   : > { %v330_v13 = vmax.f32 %v324_v11, 0.0  ;;  %v326_v14 = vadd.f32 %v325_v12, %v276_v9 }
  0xdc   : > { %v327_v15 = vpop.f32.mrf.mxu0 }
  0xdd   : > { %v333_v16 = vpack.c.bf16 %v330_v13, %v330_v13  ;;  %v331_v17 = vmax.f32 %v326_v14, 0.0 }
  0xde   : > { %v328_v18 = vpop.f32.mrf.mxu0 }
  0xdf   : > { %v334_v19 = vpack.c.bf16 %v331_v17, %v331_v17  ;;  %v347_v20 = vsel %vm345_vm2, %v333_v16, 0 }
  0xe1   : > { %496 = vmatprep.subr.msk.bf16.mxu1 %vm345_vm2, %v334_v19 }
  0xe2   : > { %367 = vmatpush1.bf16.msra.mxu1 %v347_v20 }
  0xe5   : > { %497 = vmatmul.mubr.msk.bf16.vlgmr.msra.gmra.mxu1 %vm341_vm3, %v332_v21 }
 0x1a5   : > { %v386_v22 = vpop.f32.mrf.mxu1 }
 0x1a6   : > { %v387_v25 = vadd.f32 %v386_v22, %v339_v23 }
 0x1a7   : > { %v388_v24 = vpop.f32.mrf.mxu1 }
 0x1a8   : > { %v389_v26 = vadd.f32 %v388_v24, %v339_v23 }
 0x1a9   : > { %v390_v27 = vpop.f32.mrf.mxu1 }
 0x1aa   : > { %v395_v28 = vcombine.low %v387_v25, %v389_v26 }
 0x1ab   : > { %v391_v29 = vpop.f32.mrf.mxu1 }
 0x1ac   : > { %397 = vst [vmem:[%s262_s11] sm:$0x77] %v395_v28 }
 0x1ad PF: > { %s15_s20 = sadd.s32 1, %s551_s20   ;;  %s642_s18 = smov %s547_s19 }
 0x1ae   : > { %p12_p5 = scmp.ge.s32.totalorder %s15_s20, 4   ;;  %s643_s19 = smov %s645_s21 }
 0x1b0   :  { %14 = sbr.rel (!%p12_p5) target bundleno = 2 (0x2), region = 70 }

</bundles_post_ra>
